<compile_context>
chip_gen: v5e
topology: v5e:2x2
jax: 0.10.0
libtpu: 0.0.40
codegen_flags: <defaults>
</compile_context>

<pallas_src>
import jax
import jax.numpy as jnp
from jax.experimental import pallas as pl
from jax.experimental.pallas import tpu as pltpu


def _add_pos_kernel(x_ref, pos_ref, o_ref):
    # (1, tile_rows, lane_width) VMEM tiles; pure VPU elementwise add.
    o_ref[...] = x_ref[...] + pos_ref[...]


def _tensorcores_per_chip():
    """Generation-aware TensorCore count (v7x: 2 per chip, v5e/v6e: 1)."""
    try:
        info = pltpu.get_tpu_info()
        for attr in ("num_tensorcores", "tensorcore_count", "num_cores"):
            n = getattr(info, attr, None)
            if isinstance(n, (int,)) and n > 0:
                return int(n)
    except Exception:
        pass
    try:
        kind = jax.devices()[0].device_kind.lower()
        if "v7" in kind:
            return 2
    except Exception:
        pass
    return 1


def _choose_tile_rows(rows, batch, itemsize, lane_width, *,
                      max_block_bytes, num_cores):
    """Pick tile_rows: legal sublane multiple, <= budget, enough grid steps."""
    # Sublane tile for the dtype: 8 (4-byte), 16 (2-byte), 32 (1-byte).
    sub = max(8, 32 // max(1, itemsize))

    # Legal candidates: the full extent, or divisors of `rows` that are
    # multiples of the sublane tile (keeps the last-two block dims on the
    # hardware (sub, 128) layout grid).
    cands = {rows}
    d = sub
    while d < rows:
        if rows % d == 0:
            cands.add(d)
        d += sub
    cands = sorted(cands, reverse=True)

    def block_bytes(r):
        return r * lane_width * itemsize

    # Largest candidate within the per-block VMEM budget. If even the smallest
    # legal tile exceeds it (e.g. odd `rows` at huge shapes), take the smallest
    # legal tile instead of silently over-allocating.
    fitting = [c for c in cands if block_bytes(c) <= max_block_bytes] or [cands[-1]]

    # Shrink further so the BlockSpec pipeline has work to overlap:
    # target >= 2 steps per TensorCore (>= 4 total), but never split blocks
    # below ~256 KiB, where per-step overhead starts to dominate.
    min_total_steps = max(4, 2 * num_cores)
    min_block_bytes = 256 << 10

    tile = fitting[0]
    for c in fitting:
        if block_bytes(c) < min_block_bytes:
            break
        tile = c
        if (rows // c) * batch >= min_total_steps:
            break
    return tile


def learned_positional_encoding(x, position_embeddings, *,
                                max_block_bytes=2 << 20, in_place=False):
    """x: (B, S, C); position_embeddings: (1, S, C). Returns x + pos (broadcast on B)."""
    B, S, C = x.shape
    assert position_embeddings.shape == (1, S, C)
    N = S * C
    # The module fixes S = 4096, so N is always a multiple of 128.
    assert N % 128 == 0, "S*C must be a multiple of 128 for the lane-dense layout"

    # Fold each batch row into a lane/sublane-dense 2D slab (rows, lane_width):
    # lane_width is a multiple of 128 -> full vregs, unmasked vector stores.
    lane_width = 512
    while N % lane_width:
        lane_width //= 2                    # terminates at 128 since N % 128 == 0
    rows = N // lane_width

    itemsize = jnp.dtype(x.dtype).itemsize
    num_cores = _tensorcores_per_chip()
    tile_rows = _choose_tile_rows(rows, B, itemsize, lane_width,
                                  max_block_bytes=max_block_bytes,
                                  num_cores=num_cores)
    assert rows % tile_rows == 0
    n_row_chunks = rows // tile_rows

    x3 = x.reshape(B, rows, lane_width)
    p3 = position_embeddings.reshape(1, rows, lane_width)

    # Outer axis = row chunks, inner axis = batch: the pos block index depends
    # only on the outer axis, so its tile stays resident in VMEM across the
    # batch loop (no re-DMA of the positional table per batch element).
    grid = (n_row_chunks, B)

    extra_kwargs = {}
    if in_place:
        # Only a win when the caller donates x; otherwise XLA inserts a copy.
        extra_kwargs["input_output_aliases"] = {0: 0}

    out3 = pl.pallas_call(
        _add_pos_kernel,
        out_shape=jax.ShapeDtypeStruct((B, rows, lane_width), x.dtype),
        grid_spec=pltpu.PrefetchScalarGridSpec(
            num_scalar_prefetch=0,
            grid=grid,
            in_specs=[
                # x: one lane-dense slab per (row-chunk, batch)
                pl.BlockSpec((1, tile_rows, lane_width), lambda r, b: (b, r, 0)),
                # pos: index ignores b -> broadcast over batch, tile reused in VMEM
                pl.BlockSpec((1, tile_rows, lane_width), lambda r, b: (0, r, 0)),
            ],
            out_specs=pl.BlockSpec((1, tile_rows, lane_width), lambda r, b: (b, r, 0)),
        ),
        compiler_params=pltpu.CompilerParams(
            dimension_semantics=("parallel", "parallel"),
        ),
        **extra_kwargs,
    )(x3, p3)

    return out3.reshape(B, S, C)


if __name__ == "__main__":
    # Module __init__ fixes the positional table at (1, 4096, in_channels).
    B, S, C = 2, 4096, 32

    key = jax.random.PRNGKey(0)
    kx, kp = jax.random.split(key)
    x = jax.random.normal(kx, (B, S, C), dtype=jnp.float32)
    # nn.Parameter(torch.zeros(1, 4096, C)) -> deterministic init; use small
    # random values here so the add is non-trivial to verify.
    position_embeddings = 0.02 * jax.random.normal(kp, (1, S, C), dtype=jnp.float32)

    out = learned_positional_encoding(x, position_embeddings)
    out = jax.block_until_ready(out)

    ref = x + position_embeddings  # pure-JAX reference
    assert out.shape == (B, S, C)
    assert jnp.allclose(out, ref, atol=1e-6, rtol=1e-6)

    print("KERNEL_OK")
</pallas_src>

<mosaic_0001>
module attributes {stable_mosaic.version = 11 : i64} {
  func.func @_add_pos_kernel(%arg0: i32, %arg1: i32, %arg2: memref<1x128x512xf32, #tpu.memory_space<vmem>>, %arg3: memref<1x128x512xf32, #tpu.memory_space<vmem>>, %arg4: memref<1x128x512xf32, #tpu.memory_space<vmem>>) attributes {dimension_semantics = [#tpu.dimension_semantics<parallel>, #tpu.dimension_semantics<parallel>], iteration_bounds = array<i64: 2, 2>, scalar_prefetch = 0 : i64, scratch_operands = 0 : i64, tpu.core_type = #tpu.core_type<tc>, window_params = [{transform_indices = @transform_0, window_bounds = array<i64: 1, 128, 512>}, {transform_indices = @transform_1, window_bounds = array<i64: 1, 128, 512>}, {transform_indices = @transform_2, window_bounds = array<i64: 1, 128, 512>}]} {
    %c0 = arith.constant 0 : index
    %c0_0 = arith.constant 0 : index
    %c0_1 = arith.constant 0 : index
    %0 = vector.load %arg2[%c0, %c0_0, %c0_1] : memref<1x128x512xf32, #tpu.memory_space<vmem>>, vector<1x128x512xf32>
    %c0_2 = arith.constant 0 : index
    %c0_3 = arith.constant 0 : index
    %c0_4 = arith.constant 0 : index
    %1 = vector.load %arg3[%c0_2, %c0_3, %c0_4] : memref<1x128x512xf32, #tpu.memory_space<vmem>>, vector<1x128x512xf32>
    %2 = arith.addf %0, %1 : vector<1x128x512xf32>
    %c0_5 = arith.constant 0 : index
    %c0_6 = arith.constant 0 : index
    %c0_7 = arith.constant 0 : index
    %3 = vector.load %arg4[%c0_5, %c0_6, %c0_7] : memref<1x128x512xf32, #tpu.memory_space<vmem>>, vector<1x128x512xf32>
    tpu.vector_store %arg4[%c0_5, %c0_6, %c0_7], %2 {strides = array<i32>} : memref<1x128x512xf32, #tpu.memory_space<vmem>>, vector<1x128x512xf32>,
    return
  }
  func.func @transform_0(%arg0: i32, %arg1: i32) -> (i32, i32, i32) {
    %c0_i32 = arith.constant 0 : i32
    %c0_i32_0 = arith.constant 0 : i32
    return %arg1, %arg0, %c0_i32 : i32, i32, i32
  }
  func.func @transform_1(%arg0: i32, %arg1: i32) -> (i32, i32, i32) {
    %c0_i32 = arith.constant 0 : i32
    %c0_i32_0 = arith.constant 0 : i32
    %c0_i32_1 = arith.constant 0 : i32
    return %c0_i32, %arg0, %c0_i32_0 : i32, i32, i32
  }
  func.func @transform_2(%arg0: i32, %arg1: i32) -> (i32, i32, i32) {
    %c0_i32 = arith.constant 0 : i32
    %c0_i32_0 = arith.constant 0 : i32
    return %arg1, %arg0, %c0_i32 : i32, i32, i32
  }
}

</mosaic_0001>

<bundles_post_ra>
// kernel: tpu_custom_call.1
= control target key start
LH: loop header
LB: loop body
LE: loop exit
PB: predicated region body
PF: predicated region fallthrough
CT: control target
= control target key end

     0   :  { %s1378_s0 = inlined_call_operand.hbm [shape: f32[2,256,512], index: 0, kind: input, shape index: {}]   ;;  %s1379_s1 = inlined_call_operand.hbm [shape: f32[1,256,512], index: 1, kind: input, shape index: {}]   ;;  %s1380_s2 = inlined_call_operand.hbm [shape: f32[2,256,512], index: 2, kind: output, shape index: {}]  }
   0x1   :  { %1385 = sst [smem:[#allocation14_spill]] %s1378_s0 }
   0x2   :  { %7 = vsyncpa [#allocation3], 0 }
   0x3   :  { %9 = vsyncpa [#allocation3 + $0x1], 0 }
   0x4   :  { %10 = vsyncpa [#allocation6], 0 }
   0x5   :  { %12 = vsyncpa [#allocation6 + $0x1], 0 }
   0x6   :  { %13 = vsyncpa [#allocation4], 0 }
   0x7   :  { %15 = vsyncpa [#allocation4 + $0x1], 0  ;;  %s963_s9 = smov 0   ;;  %s965_s10 = smov 0  }
   0x8   :  { %s967_s11 = smov 0   ;;  %s969_s12 = smov 0  }
   0x9   :  { %s971_s13 = smov 0   ;;  %s973_s14 = smov 0  }
   0xa   :  { %s975_s15 = smov 0   ;;  %s977_s16 = smov 0  }
   0xb   :  { %s979_s17 = smov 0   ;;  %s981_s18 = smov 0  }
   0xc   :  { %s983_s19 = smov 0  }
   0xd LB: > { %s617_s20 = sadd.s32 4294967295, %s942_s19   ;;  %s618_s21 = sadd.s32 4294967294, %s942_s19   ;;  %s942_s19 = sphi %s983_s19, %s21_s19   ;;  %s938_s18 = sphi %s981_s18, %s1410_s18   ;;  %s934_s17 = sphi %s979_s17, %s1409_s17   ;;  %s930_s16 = sphi %s977_s16, %s1408_s16   ;;  %s926_s15 = sphi %s975_s15, %s1407_s15   ;;  %s922_s14 = sphi %s973_s14, %s1406_s14   ;;  %s918_s13 = sphi %s971_s13, %s1405_s13   ;;  %s914_s12 = sphi %s969_s12, %s1404_s12   ;;  %s910_s11 = sphi %s967_s11, %s1403_s11   ;;  %s906_s10 = sphi %s965_s10, %s1402_s10   ;;  %s902_s9 = sphi %s963_s9, %s1401_s9  }
   0xe   : > { %s30_s22 = sadd.s32 1, %s934_s17  ;;  %s33_s23 = sadd.s32 1, %s938_s18 }
   0xf   : > { %p31_p0 = scmp.ge.s32.totalorder %s30_s22, 2  ;;  %s42_s24 = sadd.s32 1, %s922_s14 }
  0x10   : > { %p49_p1 = scmp.ne.s32.totalorder %s922_s14, %s918_s13  ;;  %p50_p2 = scmp.eq.s32.totalorder %s942_s19, 0 }
  0x11   : > { %s1412_s22 = smov (%p31_p0, %s30_s22), 0  ;;  %s1414_s23 = smov (!%p31_p0, %s33_s23), %s938_s18 }
  0x12   : > { %1386 = sst [smem:[#allocation11_spill]] %s1412_s22  ;;  %s37_s25 = ssub.s32 %s934_s17, %s1412_s22 }
  0x13   : > { %p1033_p3 = por %p50_p2, %p49_p1  ;;  %p35_p4 = scmp.ge.s32.totalorder %s1414_s23, 2 }
  0x14   : > { %p55_p5 = scmp.ne.s32.totalorder %s918_s13, %s914_s12  ;;  %p1039_p6 = scmp.eq.s32.totalorder %s617_s20, 0 }
  0x15   : > { %p107_p7 = scmp.eq.s32.totalorder %s617_s20, 3  ;;  %s1416_s23 = smov (%p35_p4, %s1414_s23), 0 }
  0x16   : > { %1389 = sst [smem:[#allocation12_spill]] %s1416_s23  ;;  %p1047_p8 = por %p1039_p6, %p55_p5 }
  0x17   : > { %p1051_p9 = por %p107_p7, %p49_p1  ;;  %s1057_s30 = ssub.s32 %s938_s18, %s1416_s23 }
  0x18   : > { %p113_p10 = scmp.eq.s32.totalorder %s618_s21, 3  ;;  %s39_s3 = sor.u32 %s1057_s30, %s37_s25 }
  0x19   : > { %p66_p11 = scmp.eq.s32.totalorder %s1057_s30, 0  ;;  %p40_p12 = scmp.eq.s32.totalorder %s39_s3, 0 }
  0x1a   : > { %p1061_p13 = por %p113_p10, %p55_p5  ;;  %p1384_p0 = scmp.lt.s32.totalorder %s942_s19, 4 }
  0x1b   : > { %s1067_s5 = scalar_select %p40_p12, %s922_s14, %s42_s24  }
  0x1c   : > { %s1392_s4 = scalar_select %p1061_p13, 1, 0 }
  0x1d   : > { %s133_s6 = sand.u32 1, %s922_s14   ;;  %s641_s7 = sshll.u32 %s938_s18, 6 }
  0x1e   : > { %1393 = sst [smem:[#allocation13_spill]] %s1392_s4  ;;  %s621_s8 = sshll.u32 %s133_s6, 9 }
  0x1f   : > { %s624_s20 = sshll.u32 %s934_s17, 7  ;;  %s137_s21 = scalar_lea.vmem [#allocation2], %s621_s8 }
  0x20   : > { %s143_s23 = sadd.s32 %s641_s7, %s624_s20  ;;  %s148_s25 = sshll.u32 %s137_s21, 4  ;;  %s149_s25 = int_to_ptr.vmem [resolvable:$true] %s148_s25 }
  0x21   : > { %s625_s3 = sshll.u32 %s143_s23, 3  ;;  %s1394_s0 = sld [smem:[#allocation14_spill]] }
  0x22   : > { %p652_p1 = pnand %p1384_p0, %p1033_p3  ;;  %p630_p4 = scmp.ge.s32.totalorder %s942_s19, 1 }
  0x23   : > { %s134_s8 = scalar_lea.sflag [#allocation3], %s133_s6  ;;  %s944_s20 = smov 512  }
  0x24   : > { %s945_s23 = smov 32   ;;  %p179_p5 = scmp.lt.s32.totalorder %s942_s19, 5 }
  0x25   : > { %s68_s22 = sadd.s32 1, %s910_s11  ;;  %p75_p10 = scmp.ne.s32.totalorder %s910_s11, %s906_s10 }
  0x26   : > { %p1081_p7 = pnand %p630_p4, %p179_p5  ;;  %p81_p12 = scmp.ne.s32.totalorder %s906_s10, %s902_s9 }
  0x27   : > { %s145_s24 = scalar_lea.hbm %s1394_s0, %s625_s3  ;;  %p77_p3 = por %p75_p10, %p50_p2 }
  0x28   : > { %s146_s7 = sshll.u32 %s145_s24, 4  ;;  %s158_s4 = sand.u32 1, %s910_s11   ;;  %s147_s7 = int_to_ptr.hbm [resolvable:$true] %s146_s7 }
  0x29   : > { %654 = dma.hbm_to_vmem [thread:$0]  (!%p652_p1), %s147_s7, 8192, %s149_s25, %s134_s8, %s944_s20, %s944_s20, %s945_s23  }
  0x2a   : > { %s1091_s26 = scalar_select %p66_p11, %s910_s11, %s68_s22  }
  0x2b   : > { %s643_s3 = sshll.u32 %s938_s18, 9  ;;  %p1101_p0 = por %p81_p12, %p1039_p6 }
  0x2c   : > { %s626_s25 = sshll.u32 %s158_s4, 9  ;;  %s168_s8 = scalar_lea.hbm %s1379_s1, %s643_s3 }
  0x2d   : > { %s169_s0 = sshll.u32 %s168_s8, 4  ;;  %s162_s30 = scalar_lea.vmem [#allocation5], %s626_s25  ;;  %s170_s0 = int_to_ptr.hbm [resolvable:$true] %s169_s0 }
  0x2e   : > { %s171_s22 = sshll.u32 %s162_s30, 4  ;;  %p1397_p11 = scmp.lt.s32.totalorder %s942_s19, 4  ;;  %s172_s22 = int_to_ptr.vmem [resolvable:$true] %s171_s22 }
  0x2f   : > { %s159_s9 = scalar_lea.sflag [#allocation6], %s158_s4  ;;  %183 = sbr.rel (%p1081_p7) target bundleno = 128 (0x80), region = 28 }
  0x30   : > { %p655_p2 = pnand %p1397_p11, %p77_p3  ;;  %s1113_s27 = sand.u32 (!%p1081_p7), 1, %s918_s13  }
  0x31   : > { %s631_s24 = sshll.u32 (!%p1081_p7), %s1113_s27, 9  ;;  %s186_s3 = scalar_lea.sflag (!%p1081_p7), [#allocation3], %s1113_s27 }
  0x32   : > { %657 = dma.hbm_to_vmem [thread:$0]  (!%p655_p2), %s170_s0, 8192, %s172_s22, %s159_s9, %s944_s20, %s944_s20, %s945_s23  }
  0x33   : > { %s1117_s7 = scalar_lea.vmem (!%p1081_p7), [#allocation2], %s631_s24 }
  0x34   : > { %889 = dma.done.wait (%p1047_p8), %s186_s3, 8192  }
  0x35   : > { %891 = vsyncadd (%p1047_p8), %s186_s3, 4294959104  ;;  %s195_s0 = sand.u32 1, %s906_s10  }
  0x36   : > { %s632_s20 = sshll.u32 %s195_s0, 9  ;;  %s196_s23 = scalar_lea.sflag [#allocation6], %s195_s0 }
  0x37   : > { %s1124_s21 = scalar_lea.vmem [#allocation5], %s632_s20 }
  0x38   : > { %893 = dma.done.wait (%p1101_p0), %s196_s23, 8192  }
  0x39   : > { %895 = vsyncadd (%p1101_p0), %s196_s23, 4294959104  ;;  %v229_v0 = vld [vmem:[%s1117_s7] sm:$0xff]  ;;  %v230_v2 = vld [vmem:[%s1117_s7 + $0x8] sm:$0xff]  ;;  %s1139_s28 = scalar_lea.vmem [#allocation7], %s631_s24  ;;  %s644_s4 = sshll.u32 %s930_s16, 6 }
  0x3a   : > { %v293_v1 = vld [vmem:[%s1124_s21] sm:$0xff]  ;;  %v294_v4 = vld [vmem:[%s1124_s21 + $0x8] sm:$0xff]  ;;  %v231_v5 = vld [vmem:[%s1117_s7 + $0x10] sm:$0xff]  ;;  %s637_s6 = sshll.u32 %s926_s15, 7  ;;  %s501_s22 = sshll.u32 %s1139_s28, 4  ;;  %s502_s22 = int_to_ptr.vmem [resolvable:$true] %s501_s22 }
  0x3b   : > { %v357_v3 = vadd.f32 %v293_v1, %v229_v0  ;;  %v295_v6 = vld [vmem:[%s1124_s21 + $0x10] sm:$0xff]  ;;  %v358_v7 = vadd.f32 %v294_v4, %v230_v2  ;;  %v232_v9 = vld [vmem:[%s1117_s7 + $0x18] sm:$0xff]  ;;  %v233_v11 = vld [vmem:[%s1117_s7 + $0x20] sm:$0xff]  ;;  %s498_s15 = sadd.s32 %s644_s4, %s637_s6  ;;  %s486_s24 = scalar_lea.sflag [#allocation4], %s1113_s27 }
  0x3c   : > { %v359_v8 = vadd.f32 %v295_v6, %v231_v5  ;;  %v296_v10 = vld [vmem:[%s1124_s21 + $0x18] sm:$0xff]  ;;  %v297_v13 = vld [vmem:[%s1124_s21 + $0x20] sm:$0xff]  ;;  %v234_v14 = vld [vmem:[%s1117_s7 + $0x28] sm:$0xff]  ;;  %s638_s16 = sshll.u32 %s498_s15, 3  ;;  %s836_s23 = scalar_lea.hbm %s1380_s2, 2048 }
  0x3d   : > { %421 = vst [vmem:[%s1139_s28] sm:$0xff] %v357_v3  ;;  %v360_v12 = vadd.f32 %v296_v10, %v232_v9  ;;  %v298_v15 = vld [vmem:[%s1124_s21 + $0x28] sm:$0xff]  ;;  %v361_v16 = vadd.f32 %v297_v13, %v233_v11  ;;  %v235_v18 = vld [vmem:[%s1117_s7 + $0x30] sm:$0xff]  ;;  %v236_v20 = vld [vmem:[%s1117_s7 + $0x38] sm:$0xff]  ;;  %s500_s30 = scalar_lea.hbm %s1380_s2, %s638_s16 }
  0x3e   : > { %422 = vst [vmem:[%s1139_s28 + $0x8] sm:$0xff] %v358_v7  ;;  %v362_v17 = vadd.f32 %v298_v15, %v234_v14  ;;  %v299_v19 = vld [vmem:[%s1124_s21 + $0x30] sm:$0xff]  ;;  %v300_v22 = vld [vmem:[%s1124_s21 + $0x38] sm:$0xff]  ;;  %v237_v23 = vld [vmem:[%s1117_s7 + $0x40] sm:$0xff]  ;;  %s503_s9 = sshll.u32 %s500_s30, 4  ;;  %s504_s9 = int_to_ptr.hbm [resolvable:$true] %s503_s9 }
  0x3f   : > { %423 = vst [vmem:[%s1139_s28 + $0x10] sm:$0xff] %v359_v8  ;;  %v363_v21 = vadd.f32 %v299_v19, %v235_v18  ;;  %v301_v24 = vld [vmem:[%s1124_s21 + $0x40] sm:$0xff]  ;;  %v364_v25 = vadd.f32 %v300_v22, %v236_v20  ;;  %v238_v26 = vld [vmem:[%s1117_s7 + $0x48] sm:$0xff]  ;;  %v239_v28 = vld [vmem:[%s1117_s7 + $0x50] sm:$0xff]  ;;  %s830_s3 = sshra.s32 %s504_s9, 4  ;;  %s831_s3 = int_to_ptr.hbm [resolvable:$true] %s830_s3 }
  0x40   : > { %424 = vst [vmem:[%s1139_s28 + $0x18] sm:$0xff] %v360_v12  ;;  %v302_v27 = vld [vmem:[%s1124_s21 + $0x48] sm:$0xff]  ;;  %v365_v29 = vadd.f32 %v301_v24, %v237_v23  ;;  %v303_v30 = vld [vmem:[%s1124_s21 + $0x50] sm:$0xff]  ;;  %v240_v31 = vld [vmem:[%s1117_s7 + $0x58] sm:$0xff]  ;;  %p837_p1 = scmp.lt.s32.totalorder %s831_s3, %s1380_s2 }
  0x41   : > { %425 = vst [vmem:[%s1139_s28 + $0x20] sm:$0xff] %v361_v16  ;;  %v304_v32 = vld [vmem:[%s1124_s21 + $0x58] sm:$0xff]  ;;  %v366_v33 = vadd.f32 %v302_v27, %v238_v26  ;;  %v241_v34 = vld [vmem:[%s1117_s7 + $0x60] sm:$0xff]  ;;  %v367_v36 = vadd.f32 %v303_v30, %v239_v28  ;;  %v242_v37 = vld [vmem:[%s1117_s7 + $0x68] sm:$0xff] }
  0x42   : > { %426 = vst [vmem:[%s1139_s28 + $0x28] sm:$0xff] %v362_v17  ;;  %v305_v35 = vld [vmem:[%s1124_s21 + $0x60] sm:$0xff]  ;;  %v306_v38 = vld [vmem:[%s1124_s21 + $0x68] sm:$0xff]  ;;  %v368_v39 = vadd.f32 %v304_v32, %v240_v31  ;;  %v243_v40 = vld [vmem:[%s1117_s7 + $0x70] sm:$0xff] }
  0x43   : > { %427 = vst [vmem:[%s1139_s28 + $0x30] sm:$0xff] %v363_v21  ;;  %v307_v41 = vld [vmem:[%s1124_s21 + $0x70] sm:$0xff]  ;;  %v369_v42 = vadd.f32 %v305_v35, %v241_v34  ;;  %v244_v43 = vld [vmem:[%s1117_s7 + $0x78] sm:$0xff]  ;;  %v370_v45 = vadd.f32 %v306_v38, %v242_v37  ;;  %v245_v46 = vld [vmem:[%s1117_s7 + $0x80] sm:$0xff] }
  0x44   : > { %428 = vst [vmem:[%s1139_s28 + $0x38] sm:$0xff] %v364_v25  ;;  %v308_v44 = vld [vmem:[%s1124_s21 + $0x78] sm:$0xff]  ;;  %v309_v47 = vld [vmem:[%s1124_s21 + $0x80] sm:$0xff]  ;;  %v371_v48 = vadd.f32 %v307_v41, %v243_v40  ;;  %v246_v49 = vld [vmem:[%s1117_s7 + $0x88] sm:$0xff] }
  0x45   : > { %429 = vst [vmem:[%s1139_s28 + $0x40] sm:$0xff] %v365_v29  ;;  %v310_v50 = vld [vmem:[%s1124_s21 + $0x88] sm:$0xff]  ;;  %v372_v51 = vadd.f32 %v308_v44, %v244_v43  ;;  %v247_v52 = vld [vmem:[%s1117_s7 + $0x90] sm:$0xff]  ;;  %v373_v54 = vadd.f32 %v309_v47, %v245_v46  ;;  %v248_v55 = vld [vmem:[%s1117_s7 + $0x98] sm:$0xff] }
  0x46   : > { %430 = vst [vmem:[%s1139_s28 + $0x48] sm:$0xff] %v366_v33  ;;  %v311_v53 = vld [vmem:[%s1124_s21 + $0x90] sm:$0xff]  ;;  %v312_v56 = vld [vmem:[%s1124_s21 + $0x98] sm:$0xff]  ;;  %v374_v57 = vadd.f32 %v310_v50, %v246_v49  ;;  %v249_v58 = vld [vmem:[%s1117_s7 + $0xa0] sm:$0xff] }
  0x47   : > { %431 = vst [vmem:[%s1139_s28 + $0x50] sm:$0xff] %v367_v36  ;;  %v313_v59 = vld [vmem:[%s1124_s21 + $0xa0] sm:$0xff]  ;;  %v375_v60 = vadd.f32 %v311_v53, %v247_v52  ;;  %v250_v61 = vld [vmem:[%s1117_s7 + $0xa8] sm:$0xff]  ;;  %v376_v63 = vadd.f32 %v312_v56, %v248_v55  ;;  %v251_v0 = vld [vmem:[%s1117_s7 + $0xb0] sm:$0xff] }
  0x48   : > { %432 = vst [vmem:[%s1139_s28 + $0x58] sm:$0xff] %v368_v39  ;;  %v314_v62 = vld [vmem:[%s1124_s21 + $0xa8] sm:$0xff]  ;;  %v315_v1 = vld [vmem:[%s1124_s21 + $0xb0] sm:$0xff]  ;;  %v377_v2 = vadd.f32 %v313_v59, %v249_v58  ;;  %v252_v3 = vld [vmem:[%s1117_s7 + $0xb8] sm:$0xff] }
  0x49   : > { %433 = vst [vmem:[%s1139_s28 + $0x60] sm:$0xff] %v369_v42  ;;  %v316_v4 = vld [vmem:[%s1124_s21 + $0xb8] sm:$0xff]  ;;  %v378_v5 = vadd.f32 %v314_v62, %v250_v61  ;;  %v253_v6 = vld [vmem:[%s1117_s7 + $0xc0] sm:$0xff]  ;;  %v379_v8 = vadd.f32 %v315_v1, %v251_v0  ;;  %v254_v9 = vld [vmem:[%s1117_s7 + $0xc8] sm:$0xff] }
  0x4a   : > { %434 = vst [vmem:[%s1139_s28 + $0x68] sm:$0xff] %v370_v45  ;;  %v317_v7 = vld [vmem:[%s1124_s21 + $0xc0] sm:$0xff]  ;;  %v318_v10 = vld [vmem:[%s1124_s21 + $0xc8] sm:$0xff]  ;;  %v380_v11 = vadd.f32 %v316_v4, %v252_v3  ;;  %v255_v12 = vld [vmem:[%s1117_s7 + $0xd0] sm:$0xff] }
  0x4b   : > { %435 = vst [vmem:[%s1139_s28 + $0x70] sm:$0xff] %v371_v48  ;;  %v319_v13 = vld [vmem:[%s1124_s21 + $0xd0] sm:$0xff]  ;;  %v381_v14 = vadd.f32 %v317_v7, %v253_v6  ;;  %v256_v15 = vld [vmem:[%s1117_s7 + $0xd8] sm:$0xff]  ;;  %v382_v17 = vadd.f32 %v318_v10, %v254_v9  ;;  %v257_v18 = vld [vmem:[%s1117_s7 + $0xe0] sm:$0xff] }
  0x4c   : > { %436 = vst [vmem:[%s1139_s28 + $0x78] sm:$0xff] %v372_v51  ;;  %v320_v16 = vld [vmem:[%s1124_s21 + $0xd8] sm:$0xff]  ;;  %v321_v19 = vld [vmem:[%s1124_s21 + $0xe0] sm:$0xff]  ;;  %v383_v20 = vadd.f32 %v319_v13, %v255_v12  ;;  %v258_v21 = vld [vmem:[%s1117_s7 + $0xe8] sm:$0xff] }
  0x4d   : > { %437 = vst [vmem:[%s1139_s28 + $0x80] sm:$0xff] %v373_v54  ;;  %v322_v22 = vld [vmem:[%s1124_s21 + $0xe8] sm:$0xff]  ;;  %v384_v23 = vadd.f32 %v320_v16, %v256_v15  ;;  %v259_v24 = vld [vmem:[%s1117_s7 + $0xf0] sm:$0xff]  ;;  %v385_v26 = vadd.f32 %v321_v19, %v257_v18  ;;  %v260_v27 = vld [vmem:[%s1117_s7 + $0xf8] sm:$0xff] }
  0x4e   : > { %438 = vst [vmem:[%s1139_s28 + $0x88] sm:$0xff] %v374_v57  ;;  %v323_v25 = vld [vmem:[%s1124_s21 + $0xf0] sm:$0xff]  ;;  %v324_v28 = vld [vmem:[%s1124_s21 + $0xf8] sm:$0xff]  ;;  %v386_v29 = vadd.f32 %v322_v22, %v258_v21  ;;  %v261_v30 = vld [vmem:[%s1117_s7 + $0x100] sm:$0xff] }
  0x4f   : > { %439 = vst [vmem:[%s1139_s28 + $0x90] sm:$0xff] %v375_v60  ;;  %v325_v31 = vld [vmem:[%s1124_s21 + $0x100] sm:$0xff]  ;;  %v387_v32 = vadd.f32 %v323_v25, %v259_v24  ;;  %v262_v33 = vld [vmem:[%s1117_s7 + $0x108] sm:$0xff]  ;;  %v388_v35 = vadd.f32 %v324_v28, %v260_v27  ;;  %v263_v36 = vld [vmem:[%s1117_s7 + $0x110] sm:$0xff] }
  0x50   : > { %440 = vst [vmem:[%s1139_s28 + $0x98] sm:$0xff] %v376_v63  ;;  %v326_v34 = vld [vmem:[%s1124_s21 + $0x108] sm:$0xff]  ;;  %v327_v37 = vld [vmem:[%s1124_s21 + $0x110] sm:$0xff]  ;;  %v389_v38 = vadd.f32 %v325_v31, %v261_v30  ;;  %v264_v39 = vld [vmem:[%s1117_s7 + $0x118] sm:$0xff] }
  0x51   : > { %441 = vst [vmem:[%s1139_s28 + $0xa0] sm:$0xff] %v377_v2  ;;  %v328_v40 = vld [vmem:[%s1124_s21 + $0x118] sm:$0xff]  ;;  %v390_v41 = vadd.f32 %v326_v34, %v262_v33  ;;  %v265_v42 = vld [vmem:[%s1117_s7 + $0x120] sm:$0xff]  ;;  %v391_v44 = vadd.f32 %v327_v37, %v263_v36  ;;  %v266_v45 = vld [vmem:[%s1117_s7 + $0x128] sm:$0xff] }
  0x52   : > { %442 = vst [vmem:[%s1139_s28 + $0xa8] sm:$0xff] %v378_v5  ;;  %v329_v43 = vld [vmem:[%s1124_s21 + $0x120] sm:$0xff]  ;;  %v330_v46 = vld [vmem:[%s1124_s21 + $0x128] sm:$0xff]  ;;  %v392_v47 = vadd.f32 %v328_v40, %v264_v39  ;;  %v267_v48 = vld [vmem:[%s1117_s7 + $0x130] sm:$0xff] }
  0x53   : > { %443 = vst [vmem:[%s1139_s28 + $0xb0] sm:$0xff] %v379_v8  ;;  %v331_v49 = vld [vmem:[%s1124_s21 + $0x130] sm:$0xff]  ;;  %v393_v50 = vadd.f32 %v329_v43, %v265_v42  ;;  %v268_v51 = vld [vmem:[%s1117_s7 + $0x138] sm:$0xff]  ;;  %v394_v53 = vadd.f32 %v330_v46, %v266_v45  ;;  %v269_v54 = vld [vmem:[%s1117_s7 + $0x140] sm:$0xff] }
  0x54   : > { %444 = vst [vmem:[%s1139_s28 + $0xb8] sm:$0xff] %v380_v11  ;;  %v332_v52 = vld [vmem:[%s1124_s21 + $0x138] sm:$0xff]  ;;  %v333_v55 = vld [vmem:[%s1124_s21 + $0x140] sm:$0xff]  ;;  %v395_v56 = vadd.f32 %v331_v49, %v267_v48  ;;  %v270_v57 = vld [vmem:[%s1117_s7 + $0x148] sm:$0xff] }
  0x55   : > { %445 = vst [vmem:[%s1139_s28 + $0xc0] sm:$0xff] %v381_v14  ;;  %v334_v58 = vld [vmem:[%s1124_s21 + $0x148] sm:$0xff]  ;;  %v396_v59 = vadd.f32 %v332_v52, %v268_v51  ;;  %v271_v60 = vld [vmem:[%s1117_s7 + $0x150] sm:$0xff]  ;;  %v397_v62 = vadd.f32 %v333_v55, %v269_v54  ;;  %v272_v63 = vld [vmem:[%s1117_s7 + $0x158] sm:$0xff] }
  0x56   : > { %446 = vst [vmem:[%s1139_s28 + $0xc8] sm:$0xff] %v382_v17  ;;  %v335_v61 = vld [vmem:[%s1124_s21 + $0x150] sm:$0xff]  ;;  %v336_v0 = vld [vmem:[%s1124_s21 + $0x158] sm:$0xff]  ;;  %v398_v1 = vadd.f32 %v334_v58, %v270_v57  ;;  %v273_v2 = vld [vmem:[%s1117_s7 + $0x160] sm:$0xff] }
  0x57   : > { %447 = vst [vmem:[%s1139_s28 + $0xd0] sm:$0xff] %v383_v20  ;;  %v337_v3 = vld [vmem:[%s1124_s21 + $0x160] sm:$0xff]  ;;  %v399_v4 = vadd.f32 %v335_v61, %v271_v60  ;;  %v274_v5 = vld [vmem:[%s1117_s7 + $0x168] sm:$0xff]  ;;  %v400_v7 = vadd.f32 %v336_v0, %v272_v63  ;;  %v275_v8 = vld [vmem:[%s1117_s7 + $0x170] sm:$0xff] }
  0x58   : > { %448 = vst [vmem:[%s1139_s28 + $0xd8] sm:$0xff] %v384_v23  ;;  %v338_v6 = vld [vmem:[%s1124_s21 + $0x168] sm:$0xff]  ;;  %v339_v9 = vld [vmem:[%s1124_s21 + $0x170] sm:$0xff]  ;;  %v401_v10 = vadd.f32 %v337_v3, %v273_v2  ;;  %v276_v11 = vld [vmem:[%s1117_s7 + $0x178] sm:$0xff] }
  0x59   : > { %449 = vst [vmem:[%s1139_s28 + $0xe0] sm:$0xff] %v385_v26  ;;  %v340_v12 = vld [vmem:[%s1124_s21 + $0x178] sm:$0xff]  ;;  %v402_v13 = vadd.f32 %v338_v6, %v274_v5  ;;  %v277_v14 = vld [vmem:[%s1117_s7 + $0x180] sm:$0xff]  ;;  %v403_v16 = vadd.f32 %v339_v9, %v275_v8  ;;  %v278_v17 = vld [vmem:[%s1117_s7 + $0x188] sm:$0xff] }
  0x5a   : > { %450 = vst [vmem:[%s1139_s28 + $0xe8] sm:$0xff] %v386_v29  ;;  %v341_v15 = vld [vmem:[%s1124_s21 + $0x180] sm:$0xff]  ;;  %v342_v18 = vld [vmem:[%s1124_s21 + $0x188] sm:$0xff]  ;;  %v404_v19 = vadd.f32 %v340_v12, %v276_v11  ;;  %v279_v20 = vld [vmem:[%s1117_s7 + $0x190] sm:$0xff] }
  0x5b   : > { %451 = vst [vmem:[%s1139_s28 + $0xf0] sm:$0xff] %v387_v32  ;;  %v343_v21 = vld [vmem:[%s1124_s21 + $0x190] sm:$0xff]  ;;  %v405_v22 = vadd.f32 %v341_v15, %v277_v14  ;;  %v280_v23 = vld [vmem:[%s1117_s7 + $0x198] sm:$0xff]  ;;  %v406_v25 = vadd.f32 %v342_v18, %v278_v17  ;;  %v281_v26 = vld [vmem:[%s1117_s7 + $0x1a0] sm:$0xff] }
  0x5c   : > { %452 = vst [vmem:[%s1139_s28 + $0xf8] sm:$0xff] %v388_v35  ;;  %v344_v24 = vld [vmem:[%s1124_s21 + $0x198] sm:$0xff]  ;;  %v345_v27 = vld [vmem:[%s1124_s21 + $0x1a0] sm:$0xff]  ;;  %v407_v28 = vadd.f32 %v343_v21, %v279_v20  ;;  %v282_v29 = vld [vmem:[%s1117_s7 + $0x1a8] sm:$0xff] }
  0x5d   : > { %453 = vst [vmem:[%s1139_s28 + $0x100] sm:$0xff] %v389_v38  ;;  %v346_v30 = vld [vmem:[%s1124_s21 + $0x1a8] sm:$0xff]  ;;  %v408_v31 = vadd.f32 %v344_v24, %v280_v23  ;;  %v283_v32 = vld [vmem:[%s1117_s7 + $0x1b0] sm:$0xff]  ;;  %v409_v34 = vadd.f32 %v345_v27, %v281_v26  ;;  %v284_v35 = vld [vmem:[%s1117_s7 + $0x1b8] sm:$0xff] }
  0x5e   : > { %454 = vst [vmem:[%s1139_s28 + $0x108] sm:$0xff] %v390_v41  ;;  %v347_v33 = vld [vmem:[%s1124_s21 + $0x1b0] sm:$0xff]  ;;  %v348_v36 = vld [vmem:[%s1124_s21 + $0x1b8] sm:$0xff]  ;;  %v410_v37 = vadd.f32 %v346_v30, %v282_v29  ;;  %v285_v38 = vld [vmem:[%s1117_s7 + $0x1c0] sm:$0xff] }
  0x5f   : > { %455 = vst [vmem:[%s1139_s28 + $0x110] sm:$0xff] %v391_v44  ;;  %v349_v39 = vld [vmem:[%s1124_s21 + $0x1c0] sm:$0xff]  ;;  %v411_v40 = vadd.f32 %v347_v33, %v283_v32  ;;  %v286_v41 = vld [vmem:[%s1117_s7 + $0x1c8] sm:$0xff]  ;;  %v412_v43 = vadd.f32 %v348_v36, %v284_v35  ;;  %v287_v44 = vld [vmem:[%s1117_s7 + $0x1d0] sm:$0xff] }
  0x60   : > { %456 = vst [vmem:[%s1139_s28 + $0x118] sm:$0xff] %v392_v47  ;;  %v350_v42 = vld [vmem:[%s1124_s21 + $0x1c8] sm:$0xff]  ;;  %v351_v45 = vld [vmem:[%s1124_s21 + $0x1d0] sm:$0xff]  ;;  %v413_v46 = vadd.f32 %v349_v39, %v285_v38  ;;  %v288_v47 = vld [vmem:[%s1117_s7 + $0x1d8] sm:$0xff] }
  0x61   : > { %457 = vst [vmem:[%s1139_s28 + $0x120] sm:$0xff] %v393_v50  ;;  %v352_v48 = vld [vmem:[%s1124_s21 + $0x1d8] sm:$0xff]  ;;  %v414_v49 = vadd.f32 %v350_v42, %v286_v41  ;;  %v289_v50 = vld [vmem:[%s1117_s7 + $0x1e0] sm:$0xff]  ;;  %v415_v52 = vadd.f32 %v351_v45, %v287_v44  ;;  %v354_v54 = vld [vmem:[%s1124_s21 + $0x1e8] sm:$0xff] }
  0x62   : > { %458 = vst [vmem:[%s1139_s28 + $0x128] sm:$0xff] %v394_v53  ;;  %v353_v51 = vld [vmem:[%s1124_s21 + $0x1e0] sm:$0xff]  ;;  %v290_v53 = vld [vmem:[%s1117_s7 + $0x1e8] sm:$0xff]  ;;  %v416_v55 = vadd.f32 %v352_v48, %v288_v47  ;;  %v355_v57 = vld [vmem:[%s1124_s21 + $0x1f0] sm:$0xff] }
  0x63   : > { %459 = vst [vmem:[%s1139_s28 + $0x130] sm:$0xff] %v395_v56  ;;  %v291_v56 = vld [vmem:[%s1117_s7 + $0x1f0] sm:$0xff]  ;;  %v417_v58 = vadd.f32 %v353_v51, %v289_v50  ;;  %v356_v60 = vld [vmem:[%s1124_s21 + $0x1f8] sm:$0xff]  ;;  %v418_v61 = vadd.f32 %v354_v54, %v290_v53 }
  0x64   : > { %460 = vst [vmem:[%s1139_s28 + $0x138] sm:$0xff] %v396_v59  ;;  %v292_v59 = vld [vmem:[%s1117_s7 + $0x1f8] sm:$0xff]  ;;  %s832_s7 = scalar_lea.hbm %s831_s3, 512 }
  0x65   : > { %461 = vst [vmem:[%s1139_s28 + $0x140] sm:$0xff] %v397_v62  ;;  %v419_v62 = vadd.f32 %v355_v57, %v291_v56  ;;  %v420_v63 = vadd.f32 %v356_v60, %v292_v59  ;;  %p833_p6 = scmp.ne.s32.totalorder %s831_s3, %s832_s7  ;;  %p838_p4 = scmp.lt.s32.totalorder %s836_s23, %s832_s7 }
  0x66   : > { %462 = vst [vmem:[%s1139_s28 + $0x148] sm:$0xff] %v398_v1 }
  0x67   : > { %463 = vst [vmem:[%s1139_s28 + $0x150] sm:$0xff] %v399_v4  ;;  %p834_p8 = pnand %p833_p6, %p1051_p9  ;;  %p839_p5 = por %p838_p4, %p837_p1 }
  0x68   : > { %464 = vst [vmem:[%s1139_s28 + $0x158] sm:$0xff] %v400_v7 }
  0x69   : > { %465 = vst [vmem:[%s1139_s28 + $0x160] sm:$0xff] %v401_v10  ;;  %p835_p0 = pneg %p834_p8 }
  0x6a   : > { %466 = vst [vmem:[%s1139_s28 + $0x168] sm:$0xff] %v402_v13 }
  0x6b   : > { %467 = vst [vmem:[%s1139_s28 + $0x170] sm:$0xff] %v403_v16  ;;  %p840_p7 = pnand %p839_p5, %p835_p0 }
  0x6c   : > { %468 = vst [vmem:[%s1139_s28 + $0x178] sm:$0xff] %v404_v19 }
  0x6d   : > { %469 = vst [vmem:[%s1139_s28 + $0x180] sm:$0xff] %v405_v22 }
  0x6e   : > { %470 = vst [vmem:[%s1139_s28 + $0x188] sm:$0xff] %v406_v25 }
  0x6f   : > { %471 = vst [vmem:[%s1139_s28 + $0x190] sm:$0xff] %v407_v28 }
  0x70   : > { %472 = vst [vmem:[%s1139_s28 + $0x198] sm:$0xff] %v408_v31 }
  0x71   : > { %473 = vst [vmem:[%s1139_s28 + $0x1a0] sm:$0xff] %v409_v34 }
  0x72   : > { %474 = vst [vmem:[%s1139_s28 + $0x1a8] sm:$0xff] %v410_v37 }
  0x73   : > { %475 = vst [vmem:[%s1139_s28 + $0x1b0] sm:$0xff] %v411_v40 }
  0x74   : > { %476 = vst [vmem:[%s1139_s28 + $0x1b8] sm:$0xff] %v412_v43 }
  0x75   : > { %477 = vst [vmem:[%s1139_s28 + $0x1c0] sm:$0xff] %v413_v46 }
  0x76   : > { %478 = vst [vmem:[%s1139_s28 + $0x1c8] sm:$0xff] %v414_v49 }
  0x77   : > { %479 = vst [vmem:[%s1139_s28 + $0x1d0] sm:$0xff] %v415_v52 }
  0x78   : > { %480 = vst [vmem:[%s1139_s28 + $0x1d8] sm:$0xff] %v416_v55 }
  0x79   : > { %481 = vst [vmem:[%s1139_s28 + $0x1e0] sm:$0xff] %v417_v58 }
  0x7a   : > { %482 = vst [vmem:[%s1139_s28 + $0x1e8] sm:$0xff] %v418_v61 }
  0x7b   : > { %483 = vst [vmem:[%s1139_s28 + $0x1f0] sm:$0xff] %v419_v62 }
  0x7c   : > { %484 = vst [vmem:[%s1139_s28 + $0x1f8] sm:$0xff] %v420_v63 }
  0x7d   : > { %843 = shalt.err (!%p840_p7)
}
  0x7e   : > { %s946_s27 = smov 512   ;;  %s947_s28 = smov 32  }
  0x7f   : > { %649 = dma.vmem_to_hbm [thread:$0]  (%p1051_p9), %s502_s22, 8192, %s504_s9, %s486_s24, %s946_s27, %s946_s27, %s947_s28  }
  0x80 PF: > { %p663_p10 = scmp.ge.s32.totalorder %s942_s19, 2  ;;  %s518_s15 = sand.u32 1, %s914_s12  }
  0x81   : > { %s519_s16 = scalar_lea.sflag [#allocation4], %s518_s15 }
  0x82   : > { %p659_p3 = pnand %p663_p10, %p1061_p13 }
  0x84   : > { %p660_p12 = pneg %p659_p3 }
  0x86   : > { %897 = dma.done.wait (%p660_p12), %s519_s16, 8192  }
  0x87   : > { %899 = vsyncadd (%p660_p12), %s519_s16, 4294959104  ;;  %s21_s19 = sadd.s32 1, %s942_s19   ;;  %s1399_s29 = sld [smem:[#allocation11_spill]] }
  0x88   : > { %p18_p11 = scmp.ge.s32.totalorder %s21_s19, 6   ;;  %s1400_s25 = sld [smem:[#allocation12_spill]] }
  0x89   : > { %s1401_s9 = smov %s906_s10  ;;  %s1402_s10 = smov %s910_s11 }
  0x8a   : > { %s1403_s11 = smov %s1091_s26  ;;  %s1404_s12 = smov %s918_s13 }
  0x8b   : > { %s1405_s13 = smov %s922_s14  ;;  %s1406_s14 = smov %s1067_s5 }
  0x8c   : > { %s1407_s15 = smov %s934_s17  ;;  %s1408_s16 = smov %s938_s18 }
  0x8d   : > { %s1409_s17 = smov %s1399_s29  ;;  %20 = sbr.rel (!%p18_p11) target bundleno = 13 (0xd), region = 86 }
  0x8e   : > { %s1410_s18 = smov %s1400_s25 }
  0x92   :  { %525 = vsyncpa [#allocation3], 1 }
  0x93   :  { %527 = vsyncpa [#allocation3 + $0x1], 1 }
  0x94   :  { %528 = vsyncpa [#allocation6], 1 }
  0x95   :  { %530 = vsyncpa [#allocation6 + $0x1], 1 }
  0x96   :  { %531 = vsyncpa [#allocation4], 1 }
  0x97   :  { %533 = vsyncpa [#allocation4 + $0x1], 1 }

</bundles_post_ra>
